<compile_context>
chip_gen: v6e
topology: v6e:2x2x1
jax: 0.10.0
libtpu: 0.0.40
codegen_flags: <defaults>
</compile_context>

<pallas_src>
import jax
import jax.numpy as jnp
from jax.experimental import pallas as pl
from jax.experimental.pallas import tpu as pltpu


def _soft_q_kernel(s_ref, a_ref, w1s_ref, w1a_ref, b1_ref,
                   w2_ref, b2_ref, w3_ref, b3_ref, o_ref):
    # ----- layer 1: h1 = relu(state @ w1_s + action @ w1_a + b1) -----
    s = s_ref[...].astype(jnp.bfloat16)
    a = a_ref[...].astype(jnp.bfloat16)
    h1 = jnp.dot(s, w1s_ref[...], preferred_element_type=jnp.float32)
    h1 = h1 + jnp.dot(a, w1a_ref[...], preferred_element_type=jnp.float32)
    h1 = jnp.maximum(h1 + b1_ref[...], 0.0)

    # ----- layer 2: h2 = relu(h1 @ w2 + b2) -----
    h2 = jnp.dot(h1.astype(jnp.bfloat16), w2_ref[...],
                 preferred_element_type=jnp.float32)
    h2 = jnp.maximum(h2 + b2_ref[...], 0.0)

    # ----- layer 3 (hidden -> 1): VPU multiply + lane reduce, skip the MXU -----
    q = jnp.sum(h2 * w3_ref[...], axis=-1, keepdims=True) + b3_ref[...]
    o_ref[...] = q.astype(o_ref.dtype)


def soft_q_forward(state, action, params, *, block_b=128):
    """Pallas forward pass of SoftQNetwork.

    state:  (B, num_inputs)  float32
    action: (B, num_actions) float32
    params: (w1_s, w1_a, b1, w2, b2, w3_row, b3) — weights bf16, biases/w3 f32.
    returns (B, 1) float32
    """
    w1_s, w1_a, b1, w2, b2, w3_row, b3 = params
    B, num_inputs = state.shape
    num_actions = action.shape[1]
    H = w2.shape[1]

    # Batch tile: full batch when small, otherwise tile (and pad) over batch.
    if B <= block_b:
        tb, bp = B, B
    else:
        tb = block_b                       # multiple of 8 (and of 128 here)
        bp = ((B + tb - 1) // tb) * tb
        if bp != B:
            state = jnp.pad(state, ((0, bp - B), (0, 0)))
            action = jnp.pad(action, ((0, bp - B), (0, 0)))
    grid = (bp // tb,)

    # Weights/biases: constant index_map -> fetched once, VMEM-resident.
    def const(arr):
        return pl.BlockSpec(arr.shape, lambda i: (0,) * arr.ndim)

    flops = 2 * bp * (num_inputs * H + num_actions * H + H * H + H)
    bytes_accessed = (
        state.size * state.dtype.itemsize
        + action.size * action.dtype.itemsize
        + sum(int(p.size) * p.dtype.itemsize for p in params)
        + bp * 4)

    out = pl.pallas_call(
        _soft_q_kernel,
        out_shape=jax.ShapeDtypeStruct((bp, 1), jnp.float32),
        grid=grid,
        in_specs=[
            pl.BlockSpec((tb, num_inputs), lambda i: (i, 0)),   # state tile
            pl.BlockSpec((tb, num_actions), lambda i: (i, 0)),  # action tile
            const(w1_s), const(w1_a), const(b1),
            const(w2), const(b2), const(w3_row), const(b3),
        ],
        out_specs=pl.BlockSpec((tb, 1), lambda i: (i, 0)),
        compiler_params=pltpu.CompilerParams(
            dimension_semantics=("parallel",),
            vmem_limit_bytes=32 * 1024 * 1024,
        ),
        cost_estimate=pl.CostEstimate(
            flops=flops, transcendentals=0, bytes_accessed=bytes_accessed),
    )(state, action, w1_s, w1_a, b1, w2, b2, w3_row, b3)

    return out[:B]


def init_params(key, num_inputs, num_actions, hidden_size=256, init_w=0.003):
    """Deterministic synthetic init mirroring the PyTorch module's shapes.

    linear1/linear2: U(-1/sqrt(fan_in), 1/sqrt(fan_in)); linear3: U(-init_w, init_w).
    Weights are stored transposed (in_features, out_features); matmul weights in
    bf16 (MXU-native), biases and the final-layer row in f32.
    """
    in_dim = num_inputs + num_actions
    k = jax.random.split(key, 6)

    def uni(kk, shape, bound):
        return jax.random.uniform(kk, shape, jnp.float32, -bound, bound)

    bound1 = 1.0 / jnp.sqrt(jnp.float32(in_dim))
    bound2 = 1.0 / jnp.sqrt(jnp.float32(hidden_size))

    w1 = uni(k[0], (in_dim, hidden_size), bound1)
    b1 = uni(k[1], (1, hidden_size), bound1)
    w2 = uni(k[2], (hidden_size, hidden_size), bound2)
    b2 = uni(k[3], (1, hidden_size), bound2)
    w3 = uni(k[4], (hidden_size, 1), init_w)
    b3 = uni(k[5], (1, 1), init_w)

    # Split w1 once (replaces the per-step activation concat) and cast matmul
    # weights to bf16; final layer stays f32 (used on the VPU, not the MXU).
    w1_s = w1[:num_inputs].astype(jnp.bfloat16)
    w1_a = w1[num_inputs:].astype(jnp.bfloat16)
    w2 = w2.astype(jnp.bfloat16)
    w3_row = w3.reshape(1, hidden_size)
    return (w1_s, w1_a, b1, w2, b2, w3_row, b3)


def soft_q_reference(state, action, params):
    """Pure-JAX reference using the same dtypes/accumulation as the kernel."""
    w1_s, w1_a, b1, w2, b2, w3_row, b3 = params
    s = state.astype(jnp.bfloat16)
    a = action.astype(jnp.bfloat16)
    h1 = jnp.dot(s, w1_s, preferred_element_type=jnp.float32)
    h1 = h1 + jnp.dot(a, w1_a, preferred_element_type=jnp.float32)
    h1 = jnp.maximum(h1 + b1, 0.0)
    h2 = jnp.dot(h1.astype(jnp.bfloat16), w2, preferred_element_type=jnp.float32)
    h2 = jnp.maximum(h2 + b2, 0.0)
    return jnp.sum(h2 * w3_row, axis=-1, keepdims=True) + b3


if __name__ == "__main__":
    # Small shapes consistent with the module: hidden=256 (module default),
    # batch=256 tiled as 2 grid steps of 128 to exercise the batch pipeline.
    batch = 256
    num_inputs = 16
    num_actions = 8
    hidden_size = 256

    key = jax.random.PRNGKey(0)
    k_state, k_action, k_params = jax.random.split(key, 3)

    state = jax.random.normal(k_state, (batch, num_inputs), jnp.float32)
    action = jax.random.normal(k_action, (batch, num_actions), jnp.float32)
    params = init_params(k_params, num_inputs, num_actions, hidden_size)

    q = soft_q_forward(state, action, params, block_b=128)
    q = jax.block_until_ready(q)

    q_ref = soft_q_reference(state, action, params)
    assert q.shape == (batch, 1)
    assert jnp.allclose(q, q_ref, atol=1e-3, rtol=1e-3), (
        float(jnp.max(jnp.abs(q - q_ref))))

    print("KERNEL_OK")
</pallas_src>

<mosaic_0001>
module attributes {stable_mosaic.version = 11 : i64} {
  func.func @_soft_q_kernel(%arg0: i32, %arg1: memref<128x16xf32, #tpu.memory_space<vmem>>, %arg2: memref<128x8xf32, #tpu.memory_space<vmem>>, %arg3: memref<16x256xbf16, #tpu.memory_space<vmem>>, %arg4: memref<8x256xbf16, #tpu.memory_space<vmem>>, %arg5: memref<1x256xf32, #tpu.memory_space<vmem>>, %arg6: memref<256x256xbf16, #tpu.memory_space<vmem>>, %arg7: memref<1x256xf32, #tpu.memory_space<vmem>>, %arg8: memref<1x256xf32, #tpu.memory_space<vmem>>, %arg9: memref<1x1xf32, #tpu.memory_space<vmem>>, %arg10: memref<128x1xf32, #tpu.memory_space<vmem>>) attributes {dimension_semantics = [#tpu.dimension_semantics<parallel>], iteration_bounds = array<i64: 2>, scalar_prefetch = 0 : i64, scratch_operands = 0 : i64, tpu.core_type = #tpu.core_type<tc>, window_params = [{transform_indices = @transform_0, window_bounds = array<i64: 128, 16>}, {transform_indices = @transform_1, window_bounds = array<i64: 128, 8>}, {pipeline_mode = #tpu.pipeline_mode<synchronous>, transform_indices = @transform_2, window_bounds = array<i64: 16, 256>}, {pipeline_mode = #tpu.pipeline_mode<synchronous>, transform_indices = @transform_3, window_bounds = array<i64: 8, 256>}, {pipeline_mode = #tpu.pipeline_mode<synchronous>, transform_indices = @transform_4, window_bounds = array<i64: 1, 256>}, {pipeline_mode = #tpu.pipeline_mode<synchronous>, transform_indices = @transform_5, window_bounds = array<i64: 256, 256>}, {pipeline_mode = #tpu.pipeline_mode<synchronous>, transform_indices = @transform_6, window_bounds = array<i64: 1, 256>}, {pipeline_mode = #tpu.pipeline_mode<synchronous>, transform_indices = @transform_7, window_bounds = array<i64: 1, 256>}, {pipeline_mode = #tpu.pipeline_mode<synchronous>, transform_indices = @transform_8, window_bounds = array<i64: 1, 1>}, {transform_indices = @transform_9, window_bounds = array<i64: 128, 1>}]} {
    %c0 = arith.constant 0 : index
    %c0_0 = arith.constant 0 : index
    %0 = vector.load %arg1[%c0, %c0_0] : memref<128x16xf32, #tpu.memory_space<vmem>>, vector<128x16xf32>
    %1 = arith.truncf %0 : vector<128x16xf32> to vector<128x16xbf16>
    %c0_1 = arith.constant 0 : index
    %c0_2 = arith.constant 0 : index
    %2 = vector.load %arg2[%c0_1, %c0_2] : memref<128x8xf32, #tpu.memory_space<vmem>>, vector<128x8xf32>
    %3 = arith.truncf %2 : vector<128x8xf32> to vector<128x8xbf16>
    %c0_3 = arith.constant 0 : index
    %c0_4 = arith.constant 0 : index
    %4 = vector.load %arg3[%c0_3, %c0_4] : memref<16x256xbf16, #tpu.memory_space<vmem>>, vector<16x256xbf16>
    %cst = arith.constant dense<0.000000e+00> : vector<128x256xf32>
    %5 = tpu.matmul %1, %4, %cst {dimension_numbers = #tpu.dot_dimension_numbers<[1], [0], [0], [1], [0, 0, 1, 1], [], []>} : vector<128x16xbf16>, vector<16x256xbf16>, vector<128x256xf32> -> vector<128x256xf32>
    %c0_5 = arith.constant 0 : index
    %c0_6 = arith.constant 0 : index
    %6 = vector.load %arg4[%c0_5, %c0_6] : memref<8x256xbf16, #tpu.memory_space<vmem>>, vector<8x256xbf16>
    %cst_7 = arith.constant dense<0.000000e+00> : vector<128x256xf32>
    %7 = tpu.matmul %3, %6, %cst_7 {dimension_numbers = #tpu.dot_dimension_numbers<[1], [0], [0], [1], [0, 0, 1, 1], [], []>} : vector<128x8xbf16>, vector<8x256xbf16>, vector<128x256xf32> -> vector<128x256xf32>
    %8 = arith.addf %5, %7 : vector<128x256xf32>
    %c0_8 = arith.constant 0 : index
    %c0_9 = arith.constant 0 : index
    %9 = vector.load %arg5[%c0_8, %c0_9] : memref<1x256xf32, #tpu.memory_space<vmem>>, vector<1x256xf32>
    %10 = vector.broadcast %9 : vector<1x256xf32> to vector<128x256xf32>
    %11 = arith.addf %8, %10 : vector<128x256xf32>
    %cst_10 = arith.constant 0.000000e+00 : f32
    %12 = vector.broadcast %cst_10 : f32 to vector<128x256xf32>
    %13 = arith.maximumf %11, %12 : vector<128x256xf32>
    %14 = arith.truncf %13 : vector<128x256xf32> to vector<128x256xbf16>
    %c0_11 = arith.constant 0 : index
    %c0_12 = arith.constant 0 : index
    %15 = vector.load %arg6[%c0_11, %c0_12] : memref<256x256xbf16, #tpu.memory_space<vmem>>, vector<256x256xbf16>
    %cst_13 = arith.constant dense<0.000000e+00> : vector<128x256xf32>
    %16 = tpu.matmul %14, %15, %cst_13 {dimension_numbers = #tpu.dot_dimension_numbers<[1], [0], [0], [1], [0, 0, 1, 1], [], []>} : vector<128x256xbf16>, vector<256x256xbf16>, vector<128x256xf32> -> vector<128x256xf32>
    %c0_14 = arith.constant 0 : index
    %c0_15 = arith.constant 0 : index
    %17 = vector.load %arg7[%c0_14, %c0_15] : memref<1x256xf32, #tpu.memory_space<vmem>>, vector<1x256xf32>
    %18 = vector.broadcast %17 : vector<1x256xf32> to vector<128x256xf32>
    %19 = arith.addf %16, %18 : vector<128x256xf32>
    %cst_16 = arith.constant 0.000000e+00 : f32
    %20 = vector.broadcast %cst_16 : f32 to vector<128x256xf32>
    %21 = arith.maximumf %19, %20 : vector<128x256xf32>
    %c0_17 = arith.constant 0 : index
    %c0_18 = arith.constant 0 : index
    %22 = vector.load %arg8[%c0_17, %c0_18] : memref<1x256xf32, #tpu.memory_space<vmem>>, vector<1x256xf32>
    %23 = vector.broadcast %22 : vector<1x256xf32> to vector<128x256xf32>
    %24 = arith.mulf %21, %23 : vector<128x256xf32>
    %cst_19 = arith.constant dense<0.000000e+00> : vector<128xf32>
    %25 = vector.multi_reduction <add>, %24, %cst_19 [1] : vector<128x256xf32> to vector<128xf32>
    %26 = vector.shape_cast %25 : vector<128xf32> to vector<128x1xf32>
    %c0_20 = arith.constant 0 : index
    %c0_21 = arith.constant 0 : index
    %27 = vector.load %arg9[%c0_20, %c0_21] : memref<1x1xf32, #tpu.memory_space<vmem>>, vector<1x1xf32>
    %28 = vector.broadcast %27 : vector<1x1xf32> to vector<128x1xf32>
    %29 = arith.addf %26, %28 : vector<128x1xf32>
    %c0_22 = arith.constant 0 : index
    %c0_23 = arith.constant 0 : index
    %30 = vector.load %arg10[%c0_22, %c0_23] : memref<128x1xf32, #tpu.memory_space<vmem>>, vector<128x1xf32>
    tpu.vector_store %arg10[%c0_22, %c0_23], %29 {strides = array<i32>} : memref<128x1xf32, #tpu.memory_space<vmem>>, vector<128x1xf32>,
    return
  }
  func.func @transform_0(%arg0: i32) -> (i32, i32) {
    %c0_i32 = arith.constant 0 : i32
    %c0_i32_0 = arith.constant 0 : i32
    return %arg0, %c0_i32 : i32, i32
  }
  func.func @transform_1(%arg0: i32) -> (i32, i32) {
    %c0_i32 = arith.constant 0 : i32
    %c0_i32_0 = arith.constant 0 : i32
    return %arg0, %c0_i32 : i32, i32
  }
  func.func @transform_2(%arg0: i32) -> (i32, i32) {
    %c0_i32 = arith.constant 0 : i32
    %c0_i32_0 = arith.constant 0 : i32
    %c0_i32_1 = arith.constant 0 : i32
    return %c0_i32, %c0_i32_0 : i32, i32
  }
  func.func @transform_3(%arg0: i32) -> (i32, i32) {
    %c0_i32 = arith.constant 0 : i32
    %c0_i32_0 = arith.constant 0 : i32
    %c0_i32_1 = arith.constant 0 : i32
    return %c0_i32, %c0_i32_0 : i32, i32
  }
  func.func @transform_4(%arg0: i32) -> (i32, i32) {
    %c0_i32 = arith.constant 0 : i32
    %c0_i32_0 = arith.constant 0 : i32
    %c0_i32_1 = arith.constant 0 : i32
    return %c0_i32, %c0_i32_0 : i32, i32
  }
  func.func @transform_5(%arg0: i32) -> (i32, i32) {
    %c0_i32 = arith.constant 0 : i32
    %c0_i32_0 = arith.constant 0 : i32
    %c0_i32_1 = arith.constant 0 : i32
    return %c0_i32, %c0_i32_0 : i32, i32
  }
  func.func @transform_6(%arg0: i32) -> (i32, i32) {
    %c0_i32 = arith.constant 0 : i32
    %c0_i32_0 = arith.constant 0 : i32
    %c0_i32_1 = arith.constant 0 : i32
    return %c0_i32, %c0_i32_0 : i32, i32
  }
  func.func @transform_7(%arg0: i32) -> (i32, i32) {
    %c0_i32 = arith.constant 0 : i32
    %c0_i32_0 = arith.constant 0 : i32
    %c0_i32_1 = arith.constant 0 : i32
    return %c0_i32, %c0_i32_0 : i32, i32
  }
  func.func @transform_8(%arg0: i32) -> (i32, i32) {
    %c0_i32 = arith.constant 0 : i32
    %c0_i32_0 = arith.constant 0 : i32
    %c0_i32_1 = arith.constant 0 : i32
    return %c0_i32, %c0_i32_0 : i32, i32
  }
  func.func @transform_9(%arg0: i32) -> (i32, i32) {
    %c0_i32 = arith.constant 0 : i32
    %c0_i32_0 = arith.constant 0 : i32
    return %arg0, %c0_i32 : i32, i32
  }
}

</mosaic_0001>

<bundles_post_ra>
// kernel: tpu_custom_call.1
= control target key start
LH: loop header
LB: loop body
LE: loop exit
PB: predicated region body
PF: predicated region fallthrough
CT: control target
= control target key end

     0   :  { %s1574_s11 = smov 0   ;;  %s1933_s0 = inlined_call_operand.vmem [shape: f32[256,16], index: 0, kind: input, shape index: {}]   ;;  %s1934_s1 = inlined_call_operand.vmem [shape: f32[256,8], index: 1, kind: input, shape index: {}]   ;;  %s1935_s2 = inlined_call_operand.vmem [shape: bf16[16,256], index: 2, kind: input, shape index: {}]   ;;  %s1936_s3 = inlined_call_operand.vmem [shape: bf16[8,256], index: 3, kind: input, shape index: {}]   ;;  %s1937_s4 = inlined_call_operand.vmem [shape: f32[1,256], index: 4, kind: input, shape index: {}]   ;;  %s1938_s5 = inlined_call_operand.vmem [shape: bf16[256,256], index: 5, kind: input, shape index: {}]   ;;  %s1939_s6 = inlined_call_operand.vmem [shape: f32[1,256], index: 6, kind: input, shape index: {}]   ;;  %s1940_s7 = inlined_call_operand.vmem [shape: f32[1,256], index: 7, kind: input, shape index: {}]   ;;  %s1941_s8 = inlined_call_operand.<no memory space> [shape: f32[1,1], index: 8, kind: input, shape index: {}]   ;;  %s1942_s9 = inlined_call_operand.vmem [shape: f32[256,1], index: 9, kind: output, shape index: {}]  }
   0x1   :  { %v14_v0 = vstv %s1941_s8 }
   0x2   :  { %15 = vst [vmem:[#allocation2] sm:$0x1] %v14_v0 }
   0x3 LB: > { %s1351_s12 = sadd.s32 4294967295, %s1518_s11   ;;  %p1355_p0 = scmp.ge.s32.totalorder %s1518_s11, 1  ;;  %s1518_s11 = sphi %s1574_s11, %s21_s11  }
   0x4   : > { %p301_p1 = scmp.lt.s32.totalorder %s1518_s11, 3 }
   0x6   : > { %p302_p2 = pnand %p1355_p0, %p301_p1 }
   0x7   : > { %s1356_s8 = sshll.u32 (!%p302_p2), %s1351_s12, 4 }
   0x8   : > { %305 = sbr.rel (%p302_p2) target bundleno = 632 (0x278), region = 56  ;;  %p343_p3 = scmp.lt.s32.totalorder (!%p302_p2), %s1356_s8, 31 }
   0xd   : > { %v411_v1 = vld [vmem:[%s1936_s3] sm:$0xff]  ;;  %vm442_vm0 = vcmask 1043456   ;;  %v1520_v6 = vmov 0   ;;  %s1944_s8 = smov (!%p343_p3, %s1356_s8), 31  ;;  %v1466_v8 = vld [vmem:[%s1938_s5 + $0x74] ss:$8 sps:$4 sm:$0xff]  }
   0xe   : > { %v1363_v2 = vcombine.high %v411_v1, %v411_v1  ;;  %v1460_v3 = vld [vmem:[%s1935_s2 + $0x4] ss:$8 sps:$4 sm:$0xff]   ;;  %v1362_v4 = vcombine.low %v411_v1, %v411_v1  ;;  %v1463_v5 = vld [vmem:[%s1935_s2] ss:$8 sps:$4 sm:$0xff]   ;;  %481 = vmatprep.mubr.bf16.mxu0 %v1520_v6  ;;  %629 = vmatprep.mubr.bf16.mxu1 %v1520_v6  ;;  %s1596_s21 = sshll.u32 %s1944_s8, 3  ;;  %vm417_vm1 = vcmask 64512  }
   0xf   : > { %611 = vmatprep.subr.bf16.mxu1 %v1460_v3  ;;  %s1602_s24 = scalar_lea.vmem %s1934_s1, %s1596_s21  ;;  %s1608_s27 = scalar_lea.vmem %s1933_s0, %s1596_s21  ;;  %vm572_vm2 = vcmask 130048   ;;  %v1464_v14 = vld [vmem:[%s1938_s5 + $0x70] ss:$8 sps:$4 sm:$0xff]   ;;  %v1469_v16 = vld [vmem:[%s1938_s5 + $0x64] ss:$8 sps:$4 sm:$0xff]   ;;  %vm1266_vm3 = vcmask 7168  }
  0x10   : > { %1364 = vmatprep.subr.msk.bf16.mxu0 %vm442_vm0, %v1363_v2  ;;  %v444_v7 = vsel %vm442_vm0, %v1362_v4, 0  ;;  %612 = vmatpush1.bf16.msra.mxu1 %v1463_v5  ;;  %v385_v9 = vld [vmem:[%s1602_s24] sm:$0xff]  ;;  %v386_v10 = vld [vmem:[%s1602_s24 + $0x8] sm:$0xff]  ;;  %v387_v17 = vld [vmem:[%s1602_s24 + $0x10] sm:$0xff] }
  0x11   : > { %464 = vmatpush1.bf16.msra.mxu0 %v444_v7  ;;  %1418 = vmatprep.subr.bf16.mxu1 %v1466_v8  ;;  %v361_v11 = vld [vmem:[%s1608_s27] sm:$0xff]  ;;  %v401_v12 = vpack.c.bf16 %v386_v10, %v385_v9  ;;  %v362_v13 = vld [vmem:[%s1608_s27 + $0x8] sm:$0xff]  ;;  %v388_v18 = vld [vmem:[%s1602_s24 + $0x18] sm:$0xff] }
  0x12   : > { %1006 = vmatprep.subr.bf16.mxu0 %v1466_v8  ;;  %v377_v15 = vpack.c.bf16 %v362_v13, %v361_v11  ;;  %v363_v19 = vld [vmem:[%s1608_s27 + $0x10] sm:$0xff]  ;;  %v364_v20 = vld [vmem:[%s1608_s27 + $0x18] sm:$0xff]  ;;  %v1467_v21 = vld [vmem:[%s1938_s5 + $0x60] ss:$8 sps:$4 sm:$0xff]   ;;  %v402_v23 = vpack.c.bf16 %v388_v18, %v387_v17 }
  0x13   : > { %v1472_v22 = vld [vmem:[%s1938_s5 + $0x54] ss:$8 sps:$4 sm:$0xff]   ;;  %v378_v24 = vpack.c.bf16 %v364_v20, %v363_v19  ;;  %v1470_v25 = vld [vmem:[%s1938_s5 + $0x50] ss:$8 sps:$4 sm:$0xff]   ;;  %v1475_v26 = vld [vmem:[%s1938_s5 + $0x44] ss:$8 sps:$4 sm:$0xff]  }
  0x14   : > { %1365 = vmatmul.mubr.msk.bf16.vlgmr.msra.gmra.mxu0 %vm417_vm1, %v401_v12  ;;  %1375 = vmatmul.mubr.msk.bf16.vlgmr.msra.gmra.mxu1 %vm572_vm2, %v377_v15  ;;  %v389_v27 = vld [vmem:[%s1602_s24 + $0x20] sm:$0xff]  ;;  %v390_v29 = vld [vmem:[%s1602_s24 + $0x28] sm:$0xff]  ;;  %v1478_v32 = vld [vmem:[%s1938_s5 + $0x34] ss:$8 sps:$4 sm:$0xff]  }
  0x15   : > { %491 = vmatprep.mubr.bf16.mxu0 %v1520_v6  ;;  %639 = vmatprep.mubr.bf16.mxu1 %v1520_v6  ;;  %v1473_v28 = vld [vmem:[%s1938_s5 + $0x40] ss:$8 sps:$4 sm:$0xff]   ;;  %v403_v33 = vpack.c.bf16 %v390_v29, %v389_v27  ;;  %v1476_v35 = vld [vmem:[%s1938_s5 + $0x30] ss:$8 sps:$4 sm:$0xff]   ;;  %v1481_v38 = vld [vmem:[%s1938_s5 + $0x24] ss:$8 sps:$4 sm:$0xff]  }
  0x16   : > { %1007 = vmatpush1.bf16.msra.mxu0 %v1464_v14  ;;  %1434 = vmatpush1.bf16.msra.mxu1 %v1464_v14  ;;  %v365_v30 = vld [vmem:[%s1608_s27 + $0x20] sm:$0xff]  ;;  %v366_v31 = vld [vmem:[%s1608_s27 + $0x28] sm:$0xff]  ;;  %v391_v36 = vld [vmem:[%s1602_s24 + $0x30] sm:$0xff] }
  0x17   : > { %1008 = vmatprep.subr.bf16.mxu0 %v1469_v16  ;;  %1419 = vmatprep.subr.bf16.mxu1 %v1469_v16  ;;  %v379_v34 = vpack.c.bf16 %v366_v31, %v365_v30  ;;  %v392_v37 = vld [vmem:[%s1602_s24 + $0x38] sm:$0xff]  ;;  %v367_v39 = vld [vmem:[%s1608_s27 + $0x30] sm:$0xff]  ;;  %v1479_v41 = vld [vmem:[%s1938_s5 + $0x20] ss:$8 sps:$4 sm:$0xff]  }
  0x18   : > { %v368_v40 = vld [vmem:[%s1608_s27 + $0x38] sm:$0xff]  ;;  %v404_v43 = vpack.c.bf16 %v392_v37, %v391_v36  ;;  %v1487_v46 = vld [vmem:[%s1938_s5 + $0x4] ss:$8 sps:$4 sm:$0xff]   ;;  %v1485_v51 = vld [vmem:[%s1938_s5] ss:$8 sps:$4 sm:$0xff]  }
  0x19   : > { %v1484_v42 = vld [vmem:[%s1938_s5 + $0x14] ss:$8 sps:$4 sm:$0xff]   ;;  %v380_v44 = vpack.c.bf16 %v368_v40, %v367_v39  ;;  %v1482_v45 = vld [vmem:[%s1938_s5 + $0x10] ss:$8 sps:$4 sm:$0xff]   ;;  %v393_v47 = vld [vmem:[%s1602_s24 + $0x40] sm:$0xff] }
  0x1a   : > { %1009 = vmatpush1.bf16.msra.mxu0 %v1467_v21  ;;  %1435 = vmatpush1.bf16.msra.mxu1 %v1467_v21  ;;  %v394_v48 = vld [vmem:[%s1602_s24 + $0x48] sm:$0xff]  ;;  %v369_v49 = vld [vmem:[%s1608_s27 + $0x40] sm:$0xff]  ;;  %v1490_v52 = vld [vmem:[%s1938_s5 + $0xf4] ss:$8 sps:$4 sm:$0xff]  }
  0x1b   : > { %1010 = vmatprep.subr.bf16.mxu0 %v1472_v22  ;;  %1420 = vmatprep.subr.bf16.mxu1 %v1472_v22  ;;  %v370_v50 = vld [vmem:[%s1608_s27 + $0x48] sm:$0xff]  ;;  %v405_v53 = vpack.c.bf16 %v394_v48, %v393_v47  ;;  %v1488_v55 = vld [vmem:[%s1938_s5 + $0xf0] ss:$8 sps:$4 sm:$0xff]   ;;  %v1496_v62 = vld [vmem:[%s1938_s5 + $0xd4] ss:$8 sps:$4 sm:$0xff]  }
  0x1c   : > { %1366 = vmatmul.mubr.msk.bf16.gmra.mxu0 %vm417_vm1, %v402_v23  ;;  %1376 = vmatmul.mubr.msk.bf16.gmra.mxu1 %vm572_vm2, %v378_v24  ;;  %v381_v54 = vpack.c.bf16 %v370_v50, %v369_v49  ;;  %v1493_v56 = vld [vmem:[%s1938_s5 + $0xe4] ss:$8 sps:$4 sm:$0xff]   ;;  %v395_v57 = vld [vmem:[%s1602_s24 + $0x50] sm:$0xff]  ;;  %v396_v58 = vld [vmem:[%s1602_s24 + $0x58] sm:$0xff]  ;;  %v712_v24 = vlaneseq }
  0x1d   : > { %501 = vmatprep.mubr.bf16.mxu0 %v1520_v6  ;;  %649 = vmatprep.mubr.bf16.mxu1 %v1520_v6  ;;  %v371_v59 = vld [vmem:[%s1608_s27 + $0x50] sm:$0xff]  ;;  %v372_v60 = vld [vmem:[%s1608_s27 + $0x58] sm:$0xff]  ;;  %v1491_v61 = vld [vmem:[%s1938_s5 + $0xe0] ss:$8 sps:$4 sm:$0xff]   ;;  %v406_v63 = vpack.c.bf16 %v396_v58, %v395_v57 }
  0x1e   : > { %1011 = vmatpush1.bf16.msra.mxu0 %v1470_v25  ;;  %1436 = vmatpush1.bf16.msra.mxu1 %v1470_v25  ;;  %v382_v0 = vpack.c.bf16 %v372_v60, %v371_v59  ;;  %v1494_v1 = vld [vmem:[%s1938_s5 + $0xd0] ss:$8 sps:$4 sm:$0xff]   ;;  %v1499_v2 = vld [vmem:[%s1938_s5 + $0xc4] ss:$8 sps:$4 sm:$0xff]   ;;  %v1497_v8 = vld [vmem:[%s1938_s5 + $0xc0] ss:$8 sps:$4 sm:$0xff]  }
  0x1f   : > { %1012 = vmatprep.subr.bf16.mxu0 %v1475_v26  ;;  %1421 = vmatprep.subr.bf16.mxu1 %v1475_v26  ;;  %v397_v3 = vld [vmem:[%s1602_s24 + $0x60] sm:$0xff]  ;;  %v398_v4 = vld [vmem:[%s1602_s24 + $0x68] sm:$0xff]  ;;  %v399_v11 = vld [vmem:[%s1602_s24 + $0x70] sm:$0xff]  ;;  %v713_v25 = vshrl.u32 %v712_v24, 7 }
  0x20   : > { %v373_v5 = vld [vmem:[%s1608_s27 + $0x60] sm:$0xff]  ;;  %v374_v7 = vld [vmem:[%s1608_s27 + $0x68] sm:$0xff]  ;;  %v407_v9 = vpack.c.bf16 %v398_v4, %v397_v3  ;;  %v400_v12 = vld [vmem:[%s1602_s24 + $0x78] sm:$0xff]  ;;  %s1896_s24 = scalar_lea.vmem %s1942_s9, %s1596_s21 }
  0x21   : > { %v383_v10 = vpack.c.bf16 %v374_v7, %v373_v5  ;;  %v375_v13 = vld [vmem:[%s1608_s27 + $0x70] sm:$0xff]  ;;  %v376_v14 = vld [vmem:[%s1608_s27 + $0x78] sm:$0xff]  ;;  %v408_v15 = vpack.c.bf16 %v400_v12, %v399_v11  ;;  %v1503_v19 = vld [vmem:[%s1938_s5 + $0xa0] ss:$8 sps:$4 sm:$0xff]   ;;  %v1765_v27 = vsub.s32 1, %v713_v25  ;;  %v1767_v29 = vsub.s32 0, %v713_v25 }
  0x22   : > { %1013 = vmatpush1.bf16.msra.mxu0 %v1473_v28  ;;  %1437 = vmatpush1.bf16.msra.mxu1 %v1473_v28  ;;  %v384_v16 = vpack.c.bf16 %v376_v14, %v375_v13  ;;  %v1502_v17 = vld [vmem:[%s1938_s5 + $0xb4] ss:$8 sps:$4 sm:$0xff]   ;;  %v1500_v18 = vld [vmem:[%s1938_s5 + $0xb0] ss:$8 sps:$4 sm:$0xff]   ;;  %v1511_v22 = vld [vmem:[%s1938_s5 + $0x84] ss:$8 sps:$4 sm:$0xff]  }
  0x23   : > { %1014 = vmatprep.subr.bf16.mxu0 %v1478_v32  ;;  %1422 = vmatprep.subr.bf16.mxu1 %v1478_v32  ;;  %v1508_v20 = vld [vmem:[%s1938_s5 + $0x94] ss:$8 sps:$4 sm:$0xff]   ;;  %v1506_v21 = vld [vmem:[%s1938_s5 + $0x90] ss:$8 sps:$4 sm:$0xff]   ;;  %v1509_v23 = vld [vmem:[%s1938_s5 + $0x80] ss:$8 sps:$4 sm:$0xff]  }
  0x24   : > { %1367 = vmatmul.mubr.msk.bf16.gmra.mxu0 %vm417_vm1, %v403_v33  ;;  %1377 = vmatmul.mubr.msk.bf16.gmra.mxu1 %vm572_vm2, %v379_v34  ;;  %v710_v30 = vld [vmem:[%s1937_s4] sm:$0x3] }
  0x25   : > { %511 = vmatprep.mubr.bf16.mxu0 %v1520_v6  ;;  %659 = vmatprep.mubr.bf16.mxu1 %v1520_v6  ;;  %v1773_v34 = vrot.slane %v710_v30, %v1765_v27  ;;  %v1776_v37 = vrot.slane %v710_v30, %v1767_v29 }
  0x26   : > { %1015 = vmatpush1.bf16.msra.mxu0 %v1476_v35  ;;  %1438 = vmatpush1.bf16.msra.mxu1 %v1476_v35 }
  0x27   : > { %1016 = vmatprep.subr.bf16.mxu0 %v1481_v38  ;;  %1423 = vmatprep.subr.bf16.mxu1 %v1481_v38 }
  0x2a   : > { %1017 = vmatpush1.bf16.msra.mxu0 %v1479_v41  ;;  %1439 = vmatpush1.bf16.msra.mxu1 %v1479_v41 }
  0x2b   : > { %1018 = vmatprep.subr.bf16.mxu0 %v1484_v42  ;;  %1424 = vmatprep.subr.bf16.mxu1 %v1484_v42 }
  0x2c   : > { %1368 = vmatmul.mubr.msk.bf16.gmra.mxu0 %vm417_vm1, %v404_v43  ;;  %1378 = vmatmul.mubr.msk.bf16.gmra.mxu1 %vm572_vm2, %v380_v44 }
  0x2d   : > { %521 = vmatprep.mubr.bf16.mxu0 %v1520_v6  ;;  %669 = vmatprep.mubr.bf16.mxu1 %v1520_v6 }
  0x2e   : > { %1019 = vmatpush1.bf16.msra.mxu0 %v1482_v45  ;;  %1440 = vmatpush1.bf16.msra.mxu1 %v1482_v45 }
  0x2f   : > { %1020 = vmatprep.subr.bf16.mxu0 %v1487_v46  ;;  %1425 = vmatprep.subr.bf16.mxu1 %v1487_v46 }
  0x32   : > { %1021 = vmatpush1.bf16.msra.mxu0 %v1485_v51  ;;  %1441 = vmatpush1.bf16.msra.mxu1 %v1485_v51 }
  0x33   : > { %1022 = vmatprep.subr.bf16.mxu0 %v1490_v52  ;;  %1426 = vmatprep.subr.bf16.mxu1 %v1490_v52 }
  0x34   : > { %1369 = vmatmul.mubr.msk.bf16.gmra.mxu0 %vm417_vm1, %v405_v53  ;;  %1379 = vmatmul.mubr.msk.bf16.gmra.mxu1 %vm572_vm2, %v381_v54 }
  0x35   : > { %531 = vmatprep.mubr.bf16.mxu0 %v1520_v6  ;;  %679 = vmatprep.mubr.bf16.mxu1 %v1520_v6 }
  0x36   : > { %1023 = vmatpush2.bf16.msra.mxu0 %v1488_v55  ;;  %1442 = vmatpush2.bf16.msra.mxu1 %v1488_v55 }
  0x37   : > { %1024 = vmatprep.subr.bf16.mxu0 %v1493_v56  ;;  %1427 = vmatprep.subr.bf16.mxu1 %v1493_v56 }
  0x3a   : > { %1025 = vmatpush2.bf16.msra.mxu0 %v1491_v61  ;;  %1443 = vmatpush2.bf16.msra.mxu1 %v1491_v61 }
  0x3b   : > { %1026 = vmatprep.subr.bf16.mxu0 %v1496_v62  ;;  %1428 = vmatprep.subr.bf16.mxu1 %v1496_v62 }
  0x3c   : > { %1370 = vmatmul.mubr.msk.bf16.gmra.mxu0 %vm417_vm1, %v406_v63  ;;  %1380 = vmatmul.mubr.msk.bf16.gmra.mxu1 %vm572_vm2, %v382_v0 }
  0x3d   : > { %541 = vmatprep.mubr.bf16.mxu0 %v1520_v6  ;;  %689 = vmatprep.mubr.bf16.mxu1 %v1520_v6 }
  0x3e   : > { %1027 = vmatpush2.bf16.msra.mxu0 %v1494_v1  ;;  %1444 = vmatpush2.bf16.msra.mxu1 %v1494_v1 }
  0x3f   : > { %1028 = vmatprep.subr.bf16.mxu0 %v1499_v2  ;;  %1429 = vmatprep.subr.bf16.mxu1 %v1499_v2 }
  0x42   : > { %1029 = vmatpush2.bf16.msra.mxu0 %v1497_v8  ;;  %1445 = vmatpush2.bf16.msra.mxu1 %v1497_v8 }
  0x43   : > { %1030 = vmatprep.subr.bf16.mxu0 %v1502_v17  ;;  %1430 = vmatprep.subr.bf16.mxu1 %v1502_v17 }
  0x44   : > { %1371 = vmatmul.mubr.msk.bf16.gmra.mxu0 %vm417_vm1, %v407_v9  ;;  %1381 = vmatmul.mubr.msk.bf16.gmra.mxu1 %vm572_vm2, %v383_v10 }
  0x45   : > { %551 = vmatprep.mubr.bf16.mxu0 %v1520_v6  ;;  %699 = vmatprep.mubr.bf16.mxu1 %v1520_v6  ;;  %v1505_v6 = vld [vmem:[%s1938_s5 + $0xa4] ss:$8 sps:$4 sm:$0xff]  }
  0x46   : > { %1031 = vmatpush2.bf16.msra.mxu0 %v1500_v18  ;;  %1446 = vmatpush2.bf16.msra.mxu1 %v1500_v18 }
  0x47   : > { %1032 = vmatprep.subr.bf16.mxu0 %v1505_v6  ;;  %1431 = vmatprep.subr.bf16.mxu1 %v1505_v6 }
  0x4a   : > { %1033 = vmatpush2.bf16.msra.mxu0 %v1503_v19  ;;  %1447 = vmatpush2.bf16.msra.mxu1 %v1503_v19 }
  0x4b   : > { %1034 = vmatprep.subr.bf16.mxu0 %v1508_v20  ;;  %1432 = vmatprep.subr.bf16.mxu1 %v1508_v20 }
  0x4c   : > { %1372 = vmatmul.mubr.msk.bf16.gmra.mxu0 %vm417_vm1, %v408_v15  ;;  %1382 = vmatmul.mubr.msk.bf16.gmra.mxu1 %vm572_vm2, %v384_v16 }
  0x4e   : > { %1035 = vmatpush2.bf16.msra.mxu0 %v1506_v21  ;;  %1448 = vmatpush2.bf16.msra.mxu1 %v1506_v21 }
  0x4f   : > { %1036 = vmatprep.subr.bf16.mxu0 %v1511_v22  ;;  %1433 = vmatprep.subr.bf16.mxu1 %v1511_v22 }
  0x52   : > { %1037 = vmatpush2.bf16.msra.mxu0 %v1509_v23  ;;  %1449 = vmatpush2.bf16.msra.mxu1 %v1509_v23 }
  0xd4   : > { %v483_v26 = vpop.f32.mrf.mxu0  ;;  %v631_v28 = vpop.f32.mrf.mxu1 }
  0xd5   : > { %v632_v36 = vadd.f32 %v631_v28, %v483_v26 }
  0xd6   : > { %v485_v31 = vpop.f32.mrf.mxu0  ;;  %v633_v32 = vpop.f32.mrf.mxu1 }
  0xd7   : > { %v634_v33 = vadd.f32 %v633_v32, %v485_v31  ;;  %v722_v46 = vadd.f32 %v1776_v37, %v632_v36 }
  0xd8   : > { %v487_v35 = vpop.f32.mrf.mxu0  ;;  %v635_v38 = vpop.f32.mrf.mxu1 }
  0xd9   : > { %v636_v39 = vadd.f32 %v635_v38, %v487_v35  ;;  %v723_v42 = vadd.f32 %v1773_v34, %v634_v33  ;;  %v754_v56 = vmax.f32 %v722_v46, 0.0 }
  0xda   : > { %v489_v40 = vpop.f32.mrf.mxu0  ;;  %v637_v41 = vpop.f32.mrf.mxu1 }
  0xdb   : > { %v724_v43 = vadd.f32 %v1776_v37, %v636_v39  ;;  %v638_v44 = vadd.f32 %v637_v41, %v489_v40  ;;  %v755_v52 = vmax.f32 %v723_v42, 0.0 }
  0xdc   : > { %v493_v45 = vpop.f32.mrf.mxu0  ;;  %v641_v47 = vpop.f32.mrf.mxu1 }
  0xdd   : > { %v725_v48 = vadd.f32 %v1773_v34, %v638_v44  ;;  %v756_v50 = vmax.f32 %v724_v43, 0.0  ;;  %v642_v57 = vadd.f32 %v641_v47, %v493_v45 }
  0xde   : > { %v495_v49 = vpop.f32.mrf.mxu0  ;;  %v643_v51 = vpop.f32.mrf.mxu1 }
  0xdf   : > { %v757_v53 = vmax.f32 %v725_v48, 0.0  ;;  %v644_v54 = vadd.f32 %v643_v51, %v495_v49  ;;  %v786_v62 = vpack.c.bf16 %v756_v50, %v754_v56  ;;  %v726_v4 = vadd.f32 %v1776_v37, %v642_v57 }
  0xe0   : > { %v497_v55 = vpop.f32.mrf.mxu0  ;;  %v645_v58 = vpop.f32.mrf.mxu1 }
  0xe1   : > { %v646_v59 = vadd.f32 %v645_v58, %v497_v55  ;;  %v787_v61 = vpack.c.bf16 %v757_v53, %v755_v52  ;;  %v727_v0 = vadd.f32 %v1773_v34, %v644_v54  ;;  %v758_v15 = vmax.f32 %v726_v4, 0.0 }
  0xe2   : > { %v499_v60 = vpop.f32.mrf.mxu0  ;;  %v647_v63 = vpop.f32.mrf.mxu1 }
  0xe3   : > { %v728_v1 = vadd.f32 %v1776_v37, %v646_v59  ;;  %v648_v2 = vadd.f32 %v647_v63, %v499_v60  ;;  %1038 = vmatprep.mubr.bf16.mxu0 %v787_v61  ;;  %v759_v11 = vmax.f32 %v727_v0, 0.0 }
  0xe4   : > { %v503_v3 = vpop.f32.mrf.mxu0  ;;  %v651_v5 = vpop.f32.mrf.mxu1  ;;  %1039 = vmatmul.mubr.bf16.vlgmr.msra.gmra.mxu0 %v786_v62 }
  0xe5   : > { %v729_v7 = vadd.f32 %v1773_v34, %v648_v2  ;;  %v760_v9 = vmax.f32 %v728_v1, 0.0  ;;  %v652_v16 = vadd.f32 %v651_v5, %v503_v3 }
  0xe6   : > { %v505_v8 = vpop.f32.mrf.mxu0  ;;  %v653_v10 = vpop.f32.mrf.mxu1 }
  0xe7   : > { %v761_v12 = vmax.f32 %v729_v7, 0.0  ;;  %v654_v13 = vadd.f32 %v653_v10, %v505_v8  ;;  %v788_v21 = vpack.c.bf16 %v760_v9, %v758_v15  ;;  %v730_v26 = vadd.f32 %v1776_v37, %v652_v16 }
  0xe8   : > { %v507_v14 = vpop.f32.mrf.mxu0  ;;  %v655_v17 = vpop.f32.mrf.mxu1 }
  0xe9   : > { %v656_v18 = vadd.f32 %v655_v17, %v507_v14  ;;  %v789_v19 = vpack.c.bf16 %v761_v12, %v759_v11  ;;  %v731_v22 = vadd.f32 %v1773_v34, %v654_v13  ;;  %v762_v40 = vmax.f32 %v730_v26, 0.0 }
  0xea   : > { %v509_v6 = vpop.f32.mrf.mxu0  ;;  %v657_v20 = vpop.f32.mrf.mxu1 }
  0xeb   : > { %v732_v23 = vadd.f32 %v1776_v37, %v656_v18  ;;  %v658_v24 = vadd.f32 %v657_v20, %v509_v6  ;;  %1048 = vmatprep.mubr.bf16.mxu0 %v789_v19  ;;  %v763_v35 = vmax.f32 %v731_v22, 0.0 }
  0xec   : > { %v513_v25 = vpop.f32.mrf.mxu0  ;;  %v661_v28 = vpop.f32.mrf.mxu1  ;;  %1049 = vmatmul.mubr.bf16.gmra.mxu0 %v788_v21 }
  0xed   : > { %v733_v30 = vadd.f32 %v1773_v34, %v658_v24  ;;  %v764_v32 = vmax.f32 %v732_v23, 0.0  ;;  %v662_v41 = vadd.f32 %v661_v28, %v513_v25 }
  0xee   : > { %v515_v31 = vpop.f32.mrf.mxu0  ;;  %v663_v33 = vpop.f32.mrf.mxu1 }
  0xef   : > { %v765_v36 = vmax.f32 %v733_v30, 0.0  ;;  %v664_v38 = vadd.f32 %v663_v33, %v515_v31  ;;  %v790_v47 = vpack.c.bf16 %v764_v32, %v762_v40  ;;  %v734_v52 = vadd.f32 %v1776_v37, %v662_v41 }
  0xf0   : > { %v517_v39 = vpop.f32.mrf.mxu0  ;;  %v665_v42 = vpop.f32.mrf.mxu1 }
  0xf1   : > { %v666_v43 = vadd.f32 %v665_v42, %v517_v39  ;;  %v791_v45 = vpack.c.bf16 %v765_v36, %v763_v35  ;;  %v735_v48 = vadd.f32 %v1773_v34, %v664_v38  ;;  %v766_v62 = vmax.f32 %v734_v52, 0.0 }
  0xf2   : > { %v519_v44 = vpop.f32.mrf.mxu0  ;;  %v667_v46 = vpop.f32.mrf.mxu1 }
  0xf3   : > { %v736_v49 = vadd.f32 %v1776_v37, %v666_v43  ;;  %v668_v50 = vadd.f32 %v667_v46, %v519_v44  ;;  %1058 = vmatprep.mubr.bf16.mxu0 %v791_v45  ;;  %v767_v58 = vmax.f32 %v735_v48, 0.0 }
  0xf4   : > { %v523_v51 = vpop.f32.mrf.mxu0  ;;  %v671_v53 = vpop.f32.mrf.mxu1  ;;  %1059 = vmatmul.mubr.bf16.gmra.mxu0 %v790_v47 }
  0xf5   : > { %v737_v54 = vadd.f32 %v1773_v34, %v668_v50  ;;  %v768_v56 = vmax.f32 %v736_v49, 0.0  ;;  %v672_v63 = vadd.f32 %v671_v53, %v523_v51 }
  0xf6   : > { %v525_v55 = vpop.f32.mrf.mxu0  ;;  %v673_v57 = vpop.f32.mrf.mxu1 }
  0xf7   : > { %v769_v59 = vmax.f32 %v737_v54, 0.0  ;;  %v674_v60 = vadd.f32 %v673_v57, %v525_v55  ;;  %v792_v5 = vpack.c.bf16 %v768_v56, %v766_v62  ;;  %v738_v11 = vadd.f32 %v1776_v37, %v672_v63 }
  0xf8   : > { %v527_v61 = vpop.f32.mrf.mxu0  ;;  %v675_v0 = vpop.f32.mrf.mxu1 }
  0xf9   : > { %v676_v1 = vadd.f32 %v675_v0, %v527_v61  ;;  %v793_v3 = vpack.c.bf16 %v769_v59, %v767_v58  ;;  %v739_v7 = vadd.f32 %v1773_v34, %v674_v60  ;;  %v770_v20 = vmax.f32 %v738_v11, 0.0 }
  0xfa   : > { %v529_v2 = vpop.f32.mrf.mxu0  ;;  %v677_v4 = vpop.f32.mrf.mxu1 }
  0xfb   : > { %v740_v8 = vadd.f32 %v1776_v37, %v676_v1  ;;  %v678_v9 = vadd.f32 %v677_v4, %v529_v2  ;;  %1068 = vmatprep.mubr.bf16.mxu0 %v793_v3  ;;  %v771_v17 = vmax.f32 %v739_v7, 0.0 }
  0xfc   : > { %v533_v10 = vpop.f32.mrf.mxu0  ;;  %v681_v12 = vpop.f32.mrf.mxu1  ;;  %1069 = vmatmul.mubr.bf16.gmra.mxu0 %v792_v5 }
  0xfd   : > { %v741_v13 = vadd.f32 %v1773_v34, %v678_v9  ;;  %v772_v15 = vmax.f32 %v740_v8, 0.0  ;;  %v682_v21 = vadd.f32 %v681_v12, %v533_v10 }
  0xfe   : > { %v535_v14 = vpop.f32.mrf.mxu0  ;;  %v683_v16 = vpop.f32.mrf.mxu1 }
  0xff   : > { %v773_v18 = vmax.f32 %v741_v13, 0.0  ;;  %v684_v6 = vadd.f32 %v683_v16, %v535_v14  ;;  %v794_v26 = vpack.c.bf16 %v772_v15, %v770_v20  ;;  %v742_v35 = vadd.f32 %v1776_v37, %v682_v21 }
 0x100   : > { %v537_v19 = vpop.f32.mrf.mxu0  ;;  %v685_v22 = vpop.f32.mrf.mxu1 }
 0x101   : > { %v686_v23 = vadd.f32 %v685_v22, %v537_v19  ;;  %v795_v25 = vpack.c.bf16 %v773_v18, %v771_v17  ;;  %v743_v30 = vadd.f32 %v1773_v34, %v684_v6  ;;  %v774_v46 = vmax.f32 %v742_v35, 0.0 }
 0x102   : > { %v539_v24 = vpop.f32.mrf.mxu0  ;;  %v687_v28 = vpop.f32.mrf.mxu1 }
 0x103   : > { %v744_v31 = vadd.f32 %v1776_v37, %v686_v23  ;;  %v688_v32 = vadd.f32 %v687_v28, %v539_v24  ;;  %1078 = vmatprep.mubr.bf16.mxu1 %v795_v25  ;;  %v775_v42 = vmax.f32 %v743_v30, 0.0  ;;  %v834_v23 = vld [vmem:[%s1939_s6] sm:$0x3] }
 0x104   : > { %v543_v33 = vpop.f32.mrf.mxu0  ;;  %v691_v36 = vpop.f32.mrf.mxu1  ;;  %1079 = vmatmul.mubr.bf16.vlgmr.msra.gmra.mxu1 %v794_v26  ;;  %v1814_v24 = vrot.slane %v834_v23, %v1767_v29 }
 0x105   : > { %v745_v38 = vadd.f32 %v1773_v34, %v688_v32  ;;  %v776_v40 = vmax.f32 %v744_v31, 0.0  ;;  %v692_v47 = vadd.f32 %v691_v36, %v543_v33 }
 0x106   : > { %v545_v39 = vpop.f32.mrf.mxu0  ;;  %v693_v41 = vpop.f32.mrf.mxu1 }
 0x107   : > { %v777_v43 = vmax.f32 %v745_v38, 0.0  ;;  %v694_v44 = vadd.f32 %v693_v41, %v545_v39  ;;  %v796_v53 = vpack.c.bf16 %v776_v40, %v774_v46  ;;  %v746_v58 = vadd.f32 %v1776_v37, %v692_v47 }
 0x108   : > { %v547_v45 = vpop.f32.mrf.mxu0  ;;  %v695_v48 = vpop.f32.mrf.mxu1 }
 0x109   : > { %v696_v49 = vadd.f32 %v695_v48, %v547_v45  ;;  %v797_v51 = vpack.c.bf16 %v777_v43, %v775_v42  ;;  %v747_v54 = vadd.f32 %v1773_v34, %v694_v44  ;;  %v778_v4 = vmax.f32 %v746_v58, 0.0 }
 0x10a   : > { %v549_v50 = vpop.f32.mrf.mxu0  ;;  %v697_v52 = vpop.f32.mrf.mxu1 }
 0x10b   : > { %v748_v55 = vadd.f32 %v1776_v37, %v696_v49  ;;  %v698_v56 = vadd.f32 %v697_v52, %v549_v50  ;;  %1088 = vmatprep.mubr.bf16.mxu1 %v797_v51  ;;  %v779_v0 = vmax.f32 %v747_v54, 0.0 }
 0x10c   : > { %v553_v57 = vpop.f32.mrf.mxu0  ;;  %v701_v59 = vpop.f32.mrf.mxu1  ;;  %1089 = vmatmul.mubr.bf16.gmra.mxu1 %v796_v53 }
 0x10d   : > { %v749_v60 = vadd.f32 %v1773_v34, %v698_v56  ;;  %v780_v62 = vmax.f32 %v748_v55, 0.0  ;;  %v702_v5 = vadd.f32 %v701_v59, %v553_v57 }
 0x10e   : > { %v555_v61 = vpop.f32.mrf.mxu0  ;;  %v703_v63 = vpop.f32.mrf.mxu1 }
 0x10f   : > { %v781_v1 = vmax.f32 %v749_v60, 0.0  ;;  %v704_v2 = vadd.f32 %v703_v63, %v555_v61  ;;  %v798_v12 = vpack.c.bf16 %v780_v62, %v778_v4  ;;  %v750_v16 = vadd.f32 %v1776_v37, %v702_v5 }
 0x110   : > { %v557_v3 = vpop.f32.mrf.mxu0  ;;  %v705_v7 = vpop.f32.mrf.mxu1 }
 0x111   : > { %v706_v8 = vadd.f32 %v705_v7, %v557_v3  ;;  %v799_v10 = vpack.c.bf16 %v781_v1, %v779_v0  ;;  %v751_v13 = vadd.f32 %v1773_v34, %v704_v2  ;;  %v782_v20 = vmax.f32 %v750_v16, 0.0 }
 0x112   : > { %v559_v9 = vpop.f32.mrf.mxu0  ;;  %v707_v11 = vpop.f32.mrf.mxu1 }
 0x113   : > { %v752_v14 = vadd.f32 %v1776_v37, %v706_v8  ;;  %v708_v15 = vadd.f32 %v707_v11, %v559_v9  ;;  %1098 = vmatprep.mubr.bf16.mxu1 %v799_v10  ;;  %v783_v6 = vmax.f32 %v751_v13, 0.0  ;;  %v1817_v37 = vrot.slane %v834_v23, %v1765_v27 }
 0x114   : > { %1099 = vmatmul.mubr.bf16.gmra.mxu1 %v798_v12 }
 0x115   : > { %v753_v17 = vadd.f32 %v1773_v34, %v708_v15  ;;  %v784_v18 = vmax.f32 %v752_v14, 0.0  ;;  %v1151_v34 = vld [vmem:[%s1940_s7] sm:$0x3] }
 0x116   : > { %v1825_v32 = vrot.slane %v1151_v34, %v1767_v29  ;;  %v1828_v33 = vrot.slane %v1151_v34, %v1765_v27 }
 0x117   : > { %v785_v19 = vmax.f32 %v753_v17, 0.0  ;;  %v800_v22 = vpack.c.bf16 %v784_v18, %v782_v20 }
 0x119   : > { %v801_v21 = vpack.c.bf16 %v785_v19, %v783_v6 }
 0x11b   : > { %1108 = vmatprep.mubr.bf16.mxu1 %v801_v21 }
 0x11c   : > { %1109 = vmatmul.mubr.bf16.gmra.mxu1 %v800_v22 }
 0x1a4   : > { %v1040_v25 = vpop.f32.mrf.mxu0 }
 0x1a5   : > { %v1041_v26 = vadd.f32 %v1040_v25, %v1814_v24 }
 0x1a6   : > { %v1042_v28 = vpop.f32.mrf.mxu0 }
 0x1a7   : > { %v1119_v30 = vmax.f32 %v1041_v26, 0.0  ;;  %v1043_v31 = vadd.f32 %v1042_v28, %v1817_v37 }
 0x1a8   : > { %v1044_v35 = vpop.f32.mrf.mxu0 }
 0x1a9   : > { %v1120_v36 = vmax.f32 %v1043_v31, 0.0  ;;  %v1045_v38 = vadd.f32 %v1044_v35, %v1814_v24  ;;  %v1163_v42 = vmul.f32 %v1825_v32, %v1119_v30 }
 0x1aa   : > { %v1046_v39 = vpop.f32.mrf.mxu0 }
 0x1ab   : > { %v1121_v40 = vmax.f32 %v1045_v38, 0.0  ;;  %v1047_v41 = vadd.f32 %v1046_v39, %v1817_v37  ;;  %v1164_v43 = vmul.f32 %v1828_v33, %v1120_v36 }
 0x1ac   : > { %v1050_v44 = vpop.f32.mrf.mxu0 }
 0x1ad   : > { %v1122_v45 = vmax.f32 %v1047_v41, 0.0  ;;  %v1051_v29 = vadd.f32 %v1050_v44, %v1814_v24  ;;  %v1195_v46 = vadd.f32 %v1164_v43, %v1163_v42  ;;  %v1165_v27 = vmul.f32 %v1825_v32, %v1121_v40 }
 0x1ae   : > { %v1052_v47 = vpop.f32.mrf.mxu0 }
 0x1af   : > { %v1166_v48 = vmul.f32 %v1828_v33, %v1122_v45  ;;  %v1123_v49 = vmax.f32 %v1051_v29, 0.0  ;;  %v1053_v50 = vadd.f32 %v1052_v47, %v1817_v37  ;;  %1196 = vadd.xlane.f32.xlu0 %v1195_v46 }
 0x1b0   : > { %v1054_v51 = vpop.f32.mrf.mxu0 }
 0x1b1   : > { %v1124_v52 = vmax.f32 %v1053_v50, 0.0  ;;  %v1055_v53 = vadd.f32 %v1054_v51, %v1814_v24  ;;  %v1198_v54 = vadd.f32 %v1166_v48, %v1165_v27  ;;  %v1167_v58 = vmul.f32 %v1825_v32, %v1123_v49 }
 0x1b2   : > { %v1056_v55 = vpop.f32.mrf.mxu0 }
 0x1b3   : > { %v1125_v56 = vmax.f32 %v1055_v53, 0.0  ;;  %v1057_v57 = vadd.f32 %v1056_v55, %v1817_v37  ;;  %1199 = vadd.xlane.f32.xlu0 %v1198_v54  ;;  %v1168_v59 = vmul.f32 %v1828_v33, %v1124_v52 }
 0x1b4   : > { %v1060_v60 = vpop.f32.mrf.mxu0 }
 0x1b5   : > { %v1126_v61 = vmax.f32 %v1057_v57, 0.0  ;;  %v1061_v62 = vadd.f32 %v1060_v60, %v1814_v24  ;;  %v1201_v63 = vadd.f32 %v1168_v59, %v1167_v58  ;;  %v1169_v1 = vmul.f32 %v1825_v32, %v1125_v56 }
 0x1b6   : > { %v1062_v0 = vpop.f32.mrf.mxu0 }
 0x1b7   : > { %v1170_v2 = vmul.f32 %v1828_v33, %v1126_v61  ;;  %v1127_v3 = vmax.f32 %v1061_v62, 0.0  ;;  %v1063_v4 = vadd.f32 %v1062_v0, %v1817_v37  ;;  %1202 = vadd.xlane.f32.xlu1 %v1201_v63 }
 0x1b8   : > { %v1064_v5 = vpop.f32.mrf.mxu0 }
 0x1b9   : > { %v1128_v7 = vmax.f32 %v1063_v4, 0.0  ;;  %v1065_v8 = vadd.f32 %v1064_v5, %v1814_v24  ;;  %v1204_v9 = vadd.f32 %v1170_v2, %v1169_v1  ;;  %v1171_v11 = vmul.f32 %v1825_v32, %v1127_v3 }
 0x1ba   : > { %v1066_v10 = vpop.f32.mrf.mxu0 }
 0x1bb   : > { %v1172_v12 = vmul.f32 %v1828_v33, %v1128_v7  ;;  %v1129_v13 = vmax.f32 %v1065_v8, 0.0  ;;  %v1067_v14 = vadd.f32 %v1066_v10, %v1817_v37  ;;  %1205 = vadd.xlane.f32.xlu1 %v1204_v9 }
 0x1bc   : > { %v1070_v15 = vpop.f32.mrf.mxu0 }
 0x1bd   : > { %v1130_v16 = vmax.f32 %v1067_v14, 0.0  ;;  %v1071_v17 = vadd.f32 %v1070_v15, %v1814_v24  ;;  %v1207_v18 = vadd.f32 %v1172_v12, %v1171_v11  ;;  %v1173_v19 = vmul.f32 %v1825_v32, %v1129_v13 }
 0x1be   : > { %v1072_v6 = vpop.f32.mrf.mxu0 }
 0x1bf   : > { %v1174_v20 = vmul.f32 %v1828_v33, %v1130_v16  ;;  %v1131_v21 = vmax.f32 %v1071_v17, 0.0  ;;  %v1073_v22 = vadd.f32 %v1072_v6, %v1817_v37  ;;  %1208 = vadd.xlane.f32.xlu0 %v1207_v18 }
 0x1c0   : > { %v1074_v23 = vpop.f32.mrf.mxu0 }
 0x1c1   : > { %v1132_v25 = vmax.f32 %v1073_v22, 0.0  ;;  %v1075_v34 = vadd.f32 %v1074_v23, %v1814_v24  ;;  %v1210_v26 = vadd.f32 %v1174_v20, %v1173_v19  ;;  %v1175_v30 = vmul.f32 %v1825_v32, %v1131_v21 }
 0x1c2   : > { %v1076_v28 = vpop.f32.mrf.mxu0 }
 0x1c3   : > { %v1176_v31 = vmul.f32 %v1828_v33, %v1132_v25  ;;  %v1133_v35 = vmax.f32 %v1075_v34, 0.0  ;;  %v1077_v36 = vadd.f32 %v1076_v28, %v1817_v37  ;;  %1211 = vadd.xlane.f32.xlu1 %v1210_v26 }
 0x1c4   : > { %v1080_v38 = vpop.f32.mrf.mxu1 }
 0x1c5   : > { %v1134_v39 = vmax.f32 %v1077_v36, 0.0  ;;  %v1081_v40 = vadd.f32 %v1080_v38, %v1814_v24  ;;  %v1213_v41 = vadd.f32 %v1176_v31, %v1175_v30  ;;  %v1177_v43 = vmul.f32 %v1825_v32, %v1133_v35 }
 0x1c6   : > { %v1082_v42 = vpop.f32.mrf.mxu1 }
 0x1c7   : > { %v1178_v44 = vmul.f32 %v1828_v33, %v1134_v39  ;;  %v1135_v45 = vmax.f32 %v1081_v40, 0.0  ;;  %v1083_v29 = vadd.f32 %v1082_v42, %v1817_v37  ;;  %1214 = vadd.xlane.f32.xlu0 %v1213_v41 }
 0x1c8   : > { %v1084_v46 = vpop.f32.mrf.mxu1 }
 0x1c9   : > { %v1136_v47 = vmax.f32 %v1083_v29, 0.0  ;;  %v1085_v27 = vadd.f32 %v1084_v46, %v1814_v24  ;;  %v1216_v48 = vadd.f32 %v1178_v44, %v1177_v43  ;;  %v1179_v50 = vmul.f32 %v1825_v32, %v1135_v45 }
 0x1ca   : > { %v1086_v49 = vpop.f32.mrf.mxu1 }
 0x1cb   : > { %v1180_v51 = vmul.f32 %v1828_v33, %v1136_v47  ;;  %v1137_v52 = vmax.f32 %v1085_v27, 0.0  ;;  %v1087_v53 = vadd.f32 %v1086_v49, %v1817_v37  ;;  %1217 = vadd.xlane.f32.xlu1 %v1216_v48 }
 0x1cc   : > { %v1090_v54 = vpop.f32.mrf.mxu1 }
 0x1cd   : > { %v1138_v55 = vmax.f32 %v1087_v53, 0.0  ;;  %v1091_v56 = vadd.f32 %v1090_v54, %v1814_v24  ;;  %v1219_v57 = vadd.f32 %v1180_v51, %v1179_v50  ;;  %v1181_v59 = vmul.f32 %v1825_v32, %v1137_v52 }
 0x1ce   : > { %v1092_v58 = vpop.f32.mrf.mxu1 }
 0x1cf   : > { %v1182_v60 = vmul.f32 %v1828_v33, %v1138_v55  ;;  %v1139_v61 = vmax.f32 %v1091_v56, 0.0  ;;  %v1093_v62 = vadd.f32 %v1092_v58, %v1817_v37  ;;  %1220 = vadd.xlane.f32.xlu0 %v1219_v57 }
 0x1d0   : > { %v1094_v63 = vpop.f32.mrf.mxu1 }
 0x1d1   : > { %v1140_v0 = vmax.f32 %v1093_v62, 0.0  ;;  %v1095_v1 = vadd.f32 %v1094_v63, %v1814_v24  ;;  %v1222_v2 = vadd.f32 %v1182_v60, %v1181_v59  ;;  %v1183_v4 = vmul.f32 %v1825_v32, %v1139_v61 }
 0x1d2   : > { %v1096_v3 = vpop.f32.mrf.mxu1 }
 0x1d3   : > { %v1184_v5 = vmul.f32 %v1828_v33, %v1140_v0  ;;  %v1141_v7 = vmax.f32 %v1095_v1, 0.0  ;;  %v1097_v8 = vadd.f32 %v1096_v3, %v1817_v37  ;;  %1223 = vadd.xlane.f32.xlu1 %v1222_v2 }
 0x1d4   : > { %v1100_v9 = vpop.f32.mrf.mxu1 }
 0x1d5   : > { %v1142_v10 = vmax.f32 %v1097_v8, 0.0  ;;  %v1101_v11 = vadd.f32 %v1100_v9, %v1814_v24  ;;  %v1225_v12 = vadd.f32 %v1184_v5, %v1183_v4  ;;  %v1185_v14 = vmul.f32 %v1825_v32, %v1141_v7 }
 0x1d6   : > { %v1102_v13 = vpop.f32.mrf.mxu1 }
 0x1d7   : > { %v1186_v15 = vmul.f32 %v1828_v33, %v1142_v10  ;;  %v1143_v16 = vmax.f32 %v1101_v11, 0.0  ;;  %v1103_v17 = vadd.f32 %v1102_v13, %v1817_v37  ;;  %1226 = vadd.xlane.f32.xlu0 %v1225_v12 }
 0x1d8   : > { %v1104_v18 = vpop.f32.mrf.mxu1 }
 0x1d9   : > { %v1144_v6 = vmax.f32 %v1103_v17, 0.0  ;;  %v1105_v19 = vadd.f32 %v1104_v18, %v1814_v24  ;;  %v1228_v20 = vadd.f32 %v1186_v15, %v1185_v14  ;;  %v1187_v22 = vmul.f32 %v1825_v32, %v1143_v16 }
 0x1da   : > { %v1106_v21 = vpop.f32.mrf.mxu1 }
 0x1db   : > { %v1188_v23 = vmul.f32 %v1828_v33, %v1144_v6  ;;  %v1145_v25 = vmax.f32 %v1105_v19, 0.0  ;;  %v1107_v34 = vadd.f32 %v1106_v21, %v1817_v37  ;;  %1229 = vadd.xlane.f32.xlu1 %v1228_v20 }
 0x1dc   : > { %v1110_v26 = vpop.f32.mrf.mxu1 }
 0x1dd   : > { %v1146_v28 = vmax.f32 %v1107_v34, 0.0  ;;  %v1111_v30 = vadd.f32 %v1110_v26, %v1814_v24  ;;  %v1231_v31 = vadd.f32 %v1188_v23, %v1187_v22  ;;  %v1189_v36 = vmul.f32 %v1825_v32, %v1145_v25 }
 0x1de   : > { %v1112_v35 = vpop.f32.mrf.mxu1 }
 0x1df   : > { %v1190_v38 = vmul.f32 %v1828_v33, %v1146_v28  ;;  %v1147_v39 = vmax.f32 %v1111_v30, 0.0  ;;  %v1113_v40 = vadd.f32 %v1112_v35, %v1817_v37  ;;  %1232 = vadd.xlane.f32.xlu0 %v1231_v31 }
 0x1e0   : > { %v1114_v41 = vpop.f32.mrf.mxu1 }
 0x1e1   : > { %v1148_v42 = vmax.f32 %v1113_v40, 0.0  ;;  %v1115_v43 = vadd.f32 %v1114_v41, %v1814_v24  ;;  %v1234_v44 = vadd.f32 %v1190_v38, %v1189_v36  ;;  %v1191_v29 = vmul.f32 %v1825_v32, %v1147_v39  ;;  %v1415_v24 = vld [vmem:[#allocation2] ss:$0 sm:$0xff] }
 0x1e2   : > { %v1116_v45 = vpop.f32.mrf.mxu1 }
 0x1e3   : > { %v1192_v46 = vmul.f32 %v1828_v33, %v1148_v42  ;;  %v1149_v47 = vmax.f32 %v1115_v43, 0.0  ;;  %v1117_v27 = vadd.f32 %v1116_v45, %v1817_v37  ;;  %1235 = vadd.xlane.f32.xlu1 %v1234_v44 }
 0x1e5   : > { %v1150_v48 = vmax.f32 %v1117_v27, 0.0  ;;  %v1237_v49 = vadd.f32 %v1192_v46, %v1191_v29  ;;  %v1193_v50 = vmul.f32 %v1825_v32, %v1149_v47 }
 0x1e7   : > { %v1194_v51 = vmul.f32 %v1828_v33, %v1150_v48  ;;  %1238 = vadd.xlane.f32.xlu0 %v1237_v49 }
 0x1e9   : > { %v1240_v52 = vadd.f32 %v1194_v51, %v1193_v50 }
 0x1eb   : > { %1241 = vadd.xlane.f32.xlu1 %v1240_v52 }
 0x238   : > { %v1197_v37 = vpop.xlane.xlu0 %1196 }
 0x239   : > { %v1250_v53 = vadd.f32 %v1415_v24, %v1197_v37 }
 0x23b   : > { %1267 = vst.msk [vmem:[%s1896_s24] sm:$0xff] %vm1266_vm3, %v1250_v53 }
 0x23c   : > { %v1200_v32 = vpop.xlane.xlu0 %1199 }
 0x23d   : > { %v1251_v33 = vadd.f32 %v1415_v24, %v1200_v32 }
 0x23f   : > { %1268 = vst.msk [vmem:[%s1896_s24 + $0x8] sm:$0xff] %vm1266_vm3, %v1251_v33 }
 0x240   : > { %v1203_v54 = vpop.xlane.xlu1 %1202 }
 0x241   : > { %v1252_v55 = vadd.f32 %v1415_v24, %v1203_v54 }
 0x243   : > { %1269 = vst.msk [vmem:[%s1896_s24 + $0x10] sm:$0xff] %vm1266_vm3, %v1252_v55 }
 0x244   : > { %v1206_v56 = vpop.xlane.xlu1 %1205 }
 0x245   : > { %v1253_v57 = vadd.f32 %v1415_v24, %v1206_v56 }
 0x247   : > { %1270 = vst.msk [vmem:[%s1896_s24 + $0x18] sm:$0xff] %vm1266_vm3, %v1253_v57 }
 0x248   : > { %v1209_v58 = vpop.xlane.xlu0 %1208 }
 0x249   : > { %v1254_v59 = vadd.f32 %v1415_v24, %v1209_v58 }
 0x24b   : > { %1271 = vst.msk [vmem:[%s1896_s24 + $0x20] sm:$0xff] %vm1266_vm3, %v1254_v59 }
 0x24c   : > { %v1212_v60 = vpop.xlane.xlu1 %1211 }
 0x24d   : > { %v1255_v61 = vadd.f32 %v1415_v24, %v1212_v60 }
 0x24f   : > { %1272 = vst.msk [vmem:[%s1896_s24 + $0x28] sm:$0xff] %vm1266_vm3, %v1255_v61 }
 0x250   : > { %v1215_v62 = vpop.xlane.xlu0 %1214 }
 0x251   : > { %v1256_v63 = vadd.f32 %v1415_v24, %v1215_v62 }
 0x253   : > { %1273 = vst.msk [vmem:[%s1896_s24 + $0x30] sm:$0xff] %vm1266_vm3, %v1256_v63 }
 0x254   : > { %v1218_v0 = vpop.xlane.xlu1 %1217 }
 0x255   : > { %v1257_v1 = vadd.f32 %v1415_v24, %v1218_v0 }
 0x257   : > { %1274 = vst.msk [vmem:[%s1896_s24 + $0x38] sm:$0xff] %vm1266_vm3, %v1257_v1 }
 0x258   : > { %v1221_v2 = vpop.xlane.xlu0 %1220 }
 0x259   : > { %v1258_v3 = vadd.f32 %v1415_v24, %v1221_v2 }
 0x25b   : > { %1275 = vst.msk [vmem:[%s1896_s24 + $0x40] sm:$0xff] %vm1266_vm3, %v1258_v3 }
 0x25c   : > { %v1224_v4 = vpop.xlane.xlu1 %1223 }
 0x25d   : > { %v1259_v5 = vadd.f32 %v1415_v24, %v1224_v4 }
 0x25f   : > { %1276 = vst.msk [vmem:[%s1896_s24 + $0x48] sm:$0xff] %vm1266_vm3, %v1259_v5 }
 0x260   : > { %v1227_v7 = vpop.xlane.xlu0 %1226 }
 0x261   : > { %v1260_v8 = vadd.f32 %v1415_v24, %v1227_v7 }
 0x263   : > { %1277 = vst.msk [vmem:[%s1896_s24 + $0x50] sm:$0xff] %vm1266_vm3, %v1260_v8 }
 0x264   : > { %v1230_v9 = vpop.xlane.xlu1 %1229 }
 0x265   : > { %v1261_v10 = vadd.f32 %v1415_v24, %v1230_v9 }
 0x267   : > { %1278 = vst.msk [vmem:[%s1896_s24 + $0x58] sm:$0xff] %vm1266_vm3, %v1261_v10 }
 0x268   : > { %v1233_v11 = vpop.xlane.xlu0 %1232 }
 0x269   : > { %v1262_v12 = vadd.f32 %v1415_v24, %v1233_v11 }
 0x26b   : > { %1279 = vst.msk [vmem:[%s1896_s24 + $0x60] sm:$0xff] %vm1266_vm3, %v1262_v12 }
 0x26c   : > { %v1236_v13 = vpop.xlane.xlu1 %1235 }
 0x26d   : > { %v1263_v14 = vadd.f32 %v1415_v24, %v1236_v13 }
 0x26f   : > { %1280 = vst.msk [vmem:[%s1896_s24 + $0x68] sm:$0xff] %vm1266_vm3, %v1263_v14 }
 0x270   : > { %v1239_v15 = vpop.xlane.xlu0 %1238 }
 0x271   : > { %v1264_v16 = vadd.f32 %v1415_v24, %v1239_v15 }
 0x273   : > { %1281 = vst.msk [vmem:[%s1896_s24 + $0x70] sm:$0xff] %vm1266_vm3, %v1264_v16 }
 0x274   : > { %v1242_v17 = vpop.xlane.xlu1 %1241 }
 0x275   : > { %v1265_v18 = vadd.f32 %v1415_v24, %v1242_v17 }
 0x277   : > { %1282 = vst.msk [vmem:[%s1896_s24 + $0x78] sm:$0xff] %vm1266_vm3, %v1265_v18 }
 0x278 PF: > { %s21_s11 = sadd.s32 1, %s1518_s11  }
 0x279   : > { %p18_p4 = scmp.ge.s32.totalorder %s21_s11, 4  }
 0x27b   :  { %20 = sbr.rel (!%p18_p4) target bundleno = 3 (0x3), region = 89 }

</bundles_post_ra>
